<compile_context>
chip_gen: v6e
topology: v6e:2x2x1
jax: 0.10.0
libtpu: 0.0.40
codegen_flags: <defaults>
</compile_context>

<pallas_src>
import jax
import jax.numpy as jnp
from jax import lax
from jax.experimental import pallas as pl
from jax.experimental.pallas import tpu as pltpu


def _clip_embedding_kernel(tok_ref, emb_hbm, pos_ref, out_ref, sems):
    # tok_ref : (B_padded, T) int32 in SMEM (scalar-prefetched token ids)
    # emb_hbm : (n_vocab, n_embd) ref in HBM (no automatic DMA)
    # pos_ref : (T, n_embd) in VMEM (positional embedding, grid-invariant)
    # out_ref : (Bblk, T, n_embd) VMEM output block -- rows are gathered
    #           directly into it, then the positional add happens in place
    # sems    : (Bblk, T) DMA semaphores, one per in-flight row copy
    g = pl.program_id(0)
    bblk, seq_len, _ = out_ref.shape
    n_vocab = emb_hbm.shape[0]

    # ---- Phase 1: issue row-gather DMAs for the whole batch block. ----
    # All Bblk*T (minus dedup'd) copies stay in flight concurrently.
    for i in range(bblk):  # static, small
        row = g * bblk + i

        def issue(t, prev_tok, i=i, row=row):
            # Defensive clamp: PyTorch nn.Embedding raises on out-of-range
            # ids; unclamped ids here would be out-of-bounds HBM DMAs.
            tok = jnp.clip(tok_ref[row, t], 0, n_vocab - 1)
            is_new = jnp.logical_or(t == 0, tok != prev_tok)

            @pl.when(is_new)
            def _():
                pltpu.make_async_copy(
                    emb_hbm.at[pl.ds(tok, 1), :],
                    out_ref.at[i, pl.ds(t, 1), :],
                    sems.at[i, t],
                ).start()

            return tok

        lax.fori_loop(0, seq_len, issue, jnp.int32(-1))

    # ---- Phase 2: wait / fill, in increasing t order per batch row. ----
    # The dedup predicate is recomputed from SMEM; duplicated positions are
    # filled with a cheap VMEM row copy instead of waiting on a DMA.
    for i in range(bblk):
        row = g * bblk + i

        def wait_or_copy(t, prev_tok, i=i, row=row):
            tok = jnp.clip(tok_ref[row, t], 0, n_vocab - 1)
            is_new = jnp.logical_or(t == 0, tok != prev_tok)

            @pl.when(is_new)
            def _():
                # The src slice here is only used for its shape; wait()
                # consumes the semaphore + dst byte count of the copy that was
                # actually issued in phase 1 (documented Pallas idiom).
                pltpu.make_async_copy(
                    emb_hbm.at[pl.ds(0, 1), :],
                    out_ref.at[i, pl.ds(t, 1), :],
                    sems.at[i, t],
                ).wait()

            @pl.when(jnp.logical_not(is_new))
            def _():
                # Duplicate of the previous position: replicate the row that
                # has already landed (raw embedding, pos not yet added).
                out_ref[i, pl.ds(t, 1), :] = out_ref[i, pl.ds(t - 1, 1), :]

            return tok

        lax.fori_loop(0, seq_len, wait_or_copy, jnp.int32(-1))

    # ---- Epilogue: fused positional add, dense (T, n_embd) stores. ----
    pos = pos_ref[...]
    for i in range(bblk):
        out_ref[i] = out_ref[i] + pos


def clip_embedding(tokens, token_embedding, positional_embedding, *, batch_block=8):
    """tokens: (B, T) int; token_embedding: (n_vocab, n_embd);
    positional_embedding: (n_tokens == T, n_embd); returns (B, T, n_embd)."""
    B, T = tokens.shape
    n_vocab, n_embd = token_embedding.shape
    # PyTorch's `x += positional_embedding` broadcast requires T == n_tokens.
    assert positional_embedding.shape == (T, n_embd)

    tokens = tokens.astype(jnp.int32)

    bblk = max(1, min(batch_block, B))
    n_blocks = pl.cdiv(B, bblk)
    b_padded = n_blocks * bblk
    if b_padded != B:
        # Pad with token id 0 (a valid row); padded batch rows are sliced off.
        tokens = jnp.pad(tokens, ((0, b_padded - B), (0, 0)))

    grid_spec = pltpu.PrefetchScalarGridSpec(
        num_scalar_prefetch=1,  # token ids -> SMEM, drive the gather DMAs
        grid=(n_blocks,),
        in_specs=[
            # Embedding table: stays in HBM, gathered row-by-row via DMA.
            pl.BlockSpec(memory_space=pl.ANY),
            # Positional embedding: tiny, VMEM-resident, grid-invariant.
            pl.BlockSpec((T, n_embd), lambda g, tok: (0, 0)),
        ],
        out_specs=pl.BlockSpec((bblk, T, n_embd), lambda g, tok: (g, 0, 0)),
        scratch_shapes=[
            pltpu.SemaphoreType.DMA((bblk, T)),
        ],
    )

    out = pl.pallas_call(
        _clip_embedding_kernel,
        # Output dtype matches the table (f32 here, like the PyTorch module);
        # pass a bf16 table to halve gather + writeback bytes if downstream
        # consumes bf16.
        out_shape=jax.ShapeDtypeStruct((b_padded, T, n_embd), token_embedding.dtype),
        grid_spec=grid_spec,
        compiler_params=pltpu.CompilerParams(
            # Disjoint output blocks, no cross-step state -> legal "parallel";
            # lets v7x shard the batch grid across both TensorCores.
            dimension_semantics=("parallel",),
        ),
    )(tokens, token_embedding, positional_embedding)

    return out[:B]


if __name__ == "__main__":
    # Small shapes consistent with the module: (n_vocab, n_embd, n_tokens).
    B, T = 2, 8              # batch, sequence length (== n_tokens)
    n_vocab, n_embd = 64, 128

    key = jax.random.PRNGKey(0)
    k_tok, k_emb, k_pos = jax.random.split(key, 3)

    tokens = jax.random.randint(k_tok, (B, T), 0, n_vocab, dtype=jnp.int32)
    # Mimic CLIP prompt padding (repeated pad id) to exercise the dedup path.
    tokens = tokens.at[:, T // 2:].set(0)

    token_embedding = jax.random.normal(k_emb, (n_vocab, n_embd), jnp.float32)
    positional_embedding = 0.02 * jax.random.normal(
        k_pos, (T, n_embd), jnp.float32
    )

    out = clip_embedding(tokens, token_embedding, positional_embedding)
    out = jax.block_until_ready(out)

    # Pure-JAX reference check.
    ref = jnp.take(token_embedding, tokens, axis=0) + positional_embedding[None]
    assert out.shape == (B, T, n_embd)
    assert jnp.allclose(out, ref, atol=1e-5, rtol=1e-5)

    print("KERNEL_OK")
</pallas_src>

<mosaic_0001>
module attributes {stable_mosaic.version = 11 : i64} {
  func.func @_clip_embedding_kernel(%arg0: i32, %arg1: memref<2x8xi32, #tpu.memory_space<smem>>, %arg2: memref<64x128xf32, #tpu.memory_space<any>>, %arg3: memref<8x128xf32, #tpu.memory_space<vmem>>, %arg4: memref<2x8x128xf32, #tpu.memory_space<vmem>>, %arg5: memref<2x8x!tpu.dma_semaphore, #tpu.memory_space<semaphore_mem>>) attributes {dimension_semantics = [#tpu.dimension_semantics<parallel>], iteration_bounds = array<i64: 1>, scalar_prefetch = 1 : i64, scratch_operands = 1 : i64, tpu.core_type = #tpu.core_type<tc>, window_params = [{}, {pipeline_mode = #tpu.pipeline_mode<synchronous>, transform_indices = @transform_1, window_bounds = array<i64: 8, 128>}, {transform_indices = @transform_2, window_bounds = array<i64: 2, 8, 128>}]} {
    %c2_i32 = arith.constant 2 : i32
    %0 = arith.muli %arg0, %c2_i32 : i32
    %c0_i32 = arith.constant 0 : i32
    %1 = arith.addi %0, %c0_i32 : i32
    %c-1_i32 = arith.constant -1 : i32
    %c0_i32_0 = arith.constant 0 : i32
    %c8_i32 = arith.constant 8 : i32
    %2 = arith.addi %c0_i32_0, %c8_i32 : i32
    %c1_i32 = arith.constant 1 : i32
    %3 = scf.for %arg6 = %c0_i32_0 to %2 step %c1_i32 iter_args(%arg7 = %c-1_i32) -> (i32)  : i32 {
      %29 = arith.index_cast %1 : i32 to index
      %30 = arith.index_cast %arg6 : i32 to index
      %31 = memref.load %arg1[%29, %30] : memref<2x8xi32, #tpu.memory_space<smem>>
      %c0_i32_35 = arith.constant 0 : i32
      %c63_i32 = arith.constant 63 : i32
      %32 = arith.maxsi %c0_i32_35, %31 : i32
      %33 = arith.minsi %c63_i32, %32 : i32
      %c0_i32_36 = arith.constant 0 : i32
      %34 = arith.cmpi eq, %arg6, %c0_i32_36 : i32
      %35 = arith.cmpi ne, %33, %arg7 : i32
      %36 = arith.ori %34, %35 : i1
      %37 = arith.extui %36 : i1 to i32
      %c0_i32_37 = arith.constant 0 : i32
      %38 = arith.cmpi ne, %37, %c0_i32_37 : i32
      scf.if %38 {
        %c0_i32_38 = arith.constant 0 : i32
        %c0_i32_39 = arith.constant 0 : i32
        %c0_i32_40 = arith.constant 0 : i32
        %39 = tpu.memref_slice %arg2[%33, %c0_i32_40] : memref<64x128xf32, #tpu.memory_space<any>> -> memref<1x128xf32, #tpu.memory_space<any>>
        %c0_i32_41 = arith.constant 0 : i32
        %40 = tpu.memref_slice %arg4[%c0_i32_38, %arg6, %c0_i32_41] : memref<2x8x128xf32, #tpu.memory_space<vmem>> -> memref<1x1x128xf32, #tpu.memory_space<vmem>>
        %41 = tpu.memref_squeeze %40 : memref<1x1x128xf32, #tpu.memory_space<vmem>> -> memref<1x128xf32, #tpu.memory_space<vmem>>
        %42 = tpu.memref_slice %arg5[%c0_i32_39, %arg6] : memref<2x8x!tpu.dma_semaphore, #tpu.memory_space<semaphore_mem>> -> memref<1x1x!tpu.dma_semaphore, #tpu.memory_space<semaphore_mem>>
        %43 = tpu.memref_squeeze %42 : memref<1x1x!tpu.dma_semaphore, #tpu.memory_space<semaphore_mem>> -> memref<!tpu.dma_semaphore, #tpu.memory_space<semaphore_mem>>
        tpu.enqueue_dma source(%39 : memref<1x128xf32, #tpu.memory_space<any>>) target(%41 : memref<1x128xf32, #tpu.memory_space<vmem>>) target_semaphore(%43 : memref<!tpu.dma_semaphore, #tpu.memory_space<semaphore_mem>>)
      } else {
      }
      scf.yield %33 : i32
    }
    %c8_i32_1 = arith.constant 8 : i32
    %c2_i32_2 = arith.constant 2 : i32
    %4 = arith.muli %arg0, %c2_i32_2 : i32
    %c1_i32_3 = arith.constant 1 : i32
    %5 = arith.addi %4, %c1_i32_3 : i32
    %c-1_i32_4 = arith.constant -1 : i32
    %c0_i32_5 = arith.constant 0 : i32
    %c8_i32_6 = arith.constant 8 : i32
    %6 = arith.addi %c0_i32_5, %c8_i32_6 : i32
    %c1_i32_7 = arith.constant 1 : i32
    %7 = scf.for %arg6 = %c0_i32_5 to %6 step %c1_i32_7 iter_args(%arg7 = %c-1_i32_4) -> (i32)  : i32 {
      %29 = arith.index_cast %5 : i32 to index
      %30 = arith.index_cast %arg6 : i32 to index
      %31 = memref.load %arg1[%29, %30] : memref<2x8xi32, #tpu.memory_space<smem>>
      %c0_i32_35 = arith.constant 0 : i32
      %c63_i32 = arith.constant 63 : i32
      %32 = arith.maxsi %c0_i32_35, %31 : i32
      %33 = arith.minsi %c63_i32, %32 : i32
      %c0_i32_36 = arith.constant 0 : i32
      %34 = arith.cmpi eq, %arg6, %c0_i32_36 : i32
      %35 = arith.cmpi ne, %33, %arg7 : i32
      %36 = arith.ori %34, %35 : i1
      %37 = arith.extui %36 : i1 to i32
      %c0_i32_37 = arith.constant 0 : i32
      %38 = arith.cmpi ne, %37, %c0_i32_37 : i32
      scf.if %38 {
        %c1_i32_38 = arith.constant 1 : i32
        %c1_i32_39 = arith.constant 1 : i32
        %c0_i32_40 = arith.constant 0 : i32
        %39 = tpu.memref_slice %arg2[%33, %c0_i32_40] : memref<64x128xf32, #tpu.memory_space<any>> -> memref<1x128xf32, #tpu.memory_space<any>>
        %c0_i32_41 = arith.constant 0 : i32
        %40 = tpu.memref_slice %arg4[%c1_i32_38, %arg6, %c0_i32_41] : memref<2x8x128xf32, #tpu.memory_space<vmem>> -> memref<1x1x128xf32, #tpu.memory_space<vmem>>
        %41 = tpu.memref_squeeze %40 : memref<1x1x128xf32, #tpu.memory_space<vmem>> -> memref<1x128xf32, #tpu.memory_space<vmem>>
        %42 = tpu.memref_slice %arg5[%c1_i32_39, %arg6] : memref<2x8x!tpu.dma_semaphore, #tpu.memory_space<semaphore_mem>> -> memref<1x1x!tpu.dma_semaphore, #tpu.memory_space<semaphore_mem>>
        %43 = tpu.memref_squeeze %42 : memref<1x1x!tpu.dma_semaphore, #tpu.memory_space<semaphore_mem>> -> memref<!tpu.dma_semaphore, #tpu.memory_space<semaphore_mem>>
        tpu.enqueue_dma source(%39 : memref<1x128xf32, #tpu.memory_space<any>>) target(%41 : memref<1x128xf32, #tpu.memory_space<vmem>>) target_semaphore(%43 : memref<!tpu.dma_semaphore, #tpu.memory_space<semaphore_mem>>)
      } else {
      }
      scf.yield %33 : i32
    }
    %c8_i32_8 = arith.constant 8 : i32
    %c2_i32_9 = arith.constant 2 : i32
    %8 = arith.muli %arg0, %c2_i32_9 : i32
    %c0_i32_10 = arith.constant 0 : i32
    %9 = arith.addi %8, %c0_i32_10 : i32
    %c-1_i32_11 = arith.constant -1 : i32
    %c0_i32_12 = arith.constant 0 : i32
    %c8_i32_13 = arith.constant 8 : i32
    %10 = arith.addi %c0_i32_12, %c8_i32_13 : i32
    %c1_i32_14 = arith.constant 1 : i32
    %11 = scf.for %arg6 = %c0_i32_12 to %10 step %c1_i32_14 iter_args(%arg7 = %c-1_i32_11) -> (i32)  : i32 {
      %29 = arith.index_cast %9 : i32 to index
      %30 = arith.index_cast %arg6 : i32 to index
      %31 = memref.load %arg1[%29, %30] : memref<2x8xi32, #tpu.memory_space<smem>>
      %c0_i32_35 = arith.constant 0 : i32
      %c63_i32 = arith.constant 63 : i32
      %32 = arith.maxsi %c0_i32_35, %31 : i32
      %33 = arith.minsi %c63_i32, %32 : i32
      %c0_i32_36 = arith.constant 0 : i32
      %34 = arith.cmpi eq, %arg6, %c0_i32_36 : i32
      %35 = arith.cmpi ne, %33, %arg7 : i32
      %36 = arith.ori %34, %35 : i1
      %37 = arith.extui %36 : i1 to i32
      %c0_i32_37 = arith.constant 0 : i32
      %38 = arith.cmpi ne, %37, %c0_i32_37 : i32
      scf.if %38 {
        %c0_i32_39 = arith.constant 0 : i32
        %c0_i32_40 = arith.constant 0 : i32
        %c0_i32_41 = arith.constant 0 : i32
        %c0_i32_42 = arith.constant 0 : i32
        %42 = tpu.memref_slice %arg2[%c0_i32_41, %c0_i32_42] : memref<64x128xf32, #tpu.memory_space<any>> -> memref<1x128xf32, #tpu.memory_space<any>>
        %c0_i32_43 = arith.constant 0 : i32
        %43 = tpu.memref_slice %arg4[%c0_i32_39, %arg6, %c0_i32_43] : memref<2x8x128xf32, #tpu.memory_space<vmem>> -> memref<1x1x128xf32, #tpu.memory_space<vmem>>
        %44 = tpu.memref_squeeze %43 : memref<1x1x128xf32, #tpu.memory_space<vmem>> -> memref<1x128xf32, #tpu.memory_space<vmem>>
        %45 = tpu.memref_slice %arg5[%c0_i32_40, %arg6] : memref<2x8x!tpu.dma_semaphore, #tpu.memory_space<semaphore_mem>> -> memref<1x1x!tpu.dma_semaphore, #tpu.memory_space<semaphore_mem>>
        %46 = tpu.memref_squeeze %45 : memref<1x1x!tpu.dma_semaphore, #tpu.memory_space<semaphore_mem>> -> memref<!tpu.dma_semaphore, #tpu.memory_space<semaphore_mem>>
        tpu.wait_dma2 semaphore(%46 : memref<!tpu.dma_semaphore, #tpu.memory_space<semaphore_mem>>) src(%42 : memref<1x128xf32, #tpu.memory_space<any>>) dst(%44 : memref<1x128xf32, #tpu.memory_space<vmem>>)
      } else {
      }
      %true = arith.constant true
      %39 = arith.xori %36, %true : i1
      %40 = arith.extui %39 : i1 to i32
      %c0_i32_38 = arith.constant 0 : i32
      %41 = arith.cmpi ne, %40, %c0_i32_38 : i32
      scf.if %41 {
        %c1_i32_39 = arith.constant 1 : i32
        %42 = arith.subi %arg6, %c1_i32_39 : i32
        %c0_40 = arith.constant 0 : index
        %43 = arith.index_cast %42 : i32 to index
        %c0_41 = arith.constant 0 : index
        %44 = vector.load %arg4[%c0_40, %43, %c0_41] : memref<2x8x128xf32, #tpu.memory_space<vmem>>, vector<1x1x128xf32>
        %45 = vector.shape_cast %44 : vector<1x1x128xf32> to vector<1x128xf32>
        %c0_42 = arith.constant 0 : index
        %46 = arith.index_cast %arg6 : i32 to index
        %c0_43 = arith.constant 0 : index
        %47 = vector.load %arg4[%c0_42, %46, %c0_43] : memref<2x8x128xf32, #tpu.memory_space<vmem>>, vector<1x1x128xf32>
        %48 = vector.shape_cast %47 : vector<1x1x128xf32> to vector<1x128xf32>
        %49 = vector.shape_cast %45 : vector<1x128xf32> to vector<1x1x128xf32>
        tpu.vector_store %arg4[%c0_42, %46, %c0_43], %49 {strides = array<i32>} : memref<2x8x128xf32, #tpu.memory_space<vmem>>, vector<1x1x128xf32>,
      } else {
      }
      scf.yield %33 : i32
    }
    %c8_i32_15 = arith.constant 8 : i32
    %c2_i32_16 = arith.constant 2 : i32
    %12 = arith.muli %arg0, %c2_i32_16 : i32
    %c1_i32_17 = arith.constant 1 : i32
    %13 = arith.addi %12, %c1_i32_17 : i32
    %c-1_i32_18 = arith.constant -1 : i32
    %c0_i32_19 = arith.constant 0 : i32
    %c8_i32_20 = arith.constant 8 : i32
    %14 = arith.addi %c0_i32_19, %c8_i32_20 : i32
    %c1_i32_21 = arith.constant 1 : i32
    %15 = scf.for %arg6 = %c0_i32_19 to %14 step %c1_i32_21 iter_args(%arg7 = %c-1_i32_18) -> (i32)  : i32 {
      %29 = arith.index_cast %13 : i32 to index
      %30 = arith.index_cast %arg6 : i32 to index
      %31 = memref.load %arg1[%29, %30] : memref<2x8xi32, #tpu.memory_space<smem>>
      %c0_i32_35 = arith.constant 0 : i32
      %c63_i32 = arith.constant 63 : i32
      %32 = arith.maxsi %c0_i32_35, %31 : i32
      %33 = arith.minsi %c63_i32, %32 : i32
      %c0_i32_36 = arith.constant 0 : i32
      %34 = arith.cmpi eq, %arg6, %c0_i32_36 : i32
      %35 = arith.cmpi ne, %33, %arg7 : i32
      %36 = arith.ori %34, %35 : i1
      %37 = arith.extui %36 : i1 to i32
      %c0_i32_37 = arith.constant 0 : i32
      %38 = arith.cmpi ne, %37, %c0_i32_37 : i32
      scf.if %38 {
        %c1_i32_39 = arith.constant 1 : i32
        %c1_i32_40 = arith.constant 1 : i32
        %c0_i32_41 = arith.constant 0 : i32
        %c0_i32_42 = arith.constant 0 : i32
        %42 = tpu.memref_slice %arg2[%c0_i32_41, %c0_i32_42] : memref<64x128xf32, #tpu.memory_space<any>> -> memref<1x128xf32, #tpu.memory_space<any>>
        %c0_i32_43 = arith.constant 0 : i32
        %43 = tpu.memref_slice %arg4[%c1_i32_39, %arg6, %c0_i32_43] : memref<2x8x128xf32, #tpu.memory_space<vmem>> -> memref<1x1x128xf32, #tpu.memory_space<vmem>>
        %44 = tpu.memref_squeeze %43 : memref<1x1x128xf32, #tpu.memory_space<vmem>> -> memref<1x128xf32, #tpu.memory_space<vmem>>
        %45 = tpu.memref_slice %arg5[%c1_i32_40, %arg6] : memref<2x8x!tpu.dma_semaphore, #tpu.memory_space<semaphore_mem>> -> memref<1x1x!tpu.dma_semaphore, #tpu.memory_space<semaphore_mem>>
        %46 = tpu.memref_squeeze %45 : memref<1x1x!tpu.dma_semaphore, #tpu.memory_space<semaphore_mem>> -> memref<!tpu.dma_semaphore, #tpu.memory_space<semaphore_mem>>
        tpu.wait_dma2 semaphore(%46 : memref<!tpu.dma_semaphore, #tpu.memory_space<semaphore_mem>>) src(%42 : memref<1x128xf32, #tpu.memory_space<any>>) dst(%44 : memref<1x128xf32, #tpu.memory_space<vmem>>)
      } else {
      }
      %true = arith.constant true
      %39 = arith.xori %36, %true : i1
      %40 = arith.extui %39 : i1 to i32
      %c0_i32_38 = arith.constant 0 : i32
      %41 = arith.cmpi ne, %40, %c0_i32_38 : i32
      scf.if %41 {
        %c1_i32_39 = arith.constant 1 : i32
        %42 = arith.subi %arg6, %c1_i32_39 : i32
        %c1_40 = arith.constant 1 : index
        %43 = arith.index_cast %42 : i32 to index
        %c0_41 = arith.constant 0 : index
        %44 = vector.load %arg4[%c1_40, %43, %c0_41] : memref<2x8x128xf32, #tpu.memory_space<vmem>>, vector<1x1x128xf32>
        %45 = vector.shape_cast %44 : vector<1x1x128xf32> to vector<1x128xf32>
        %c1_42 = arith.constant 1 : index
        %46 = arith.index_cast %arg6 : i32 to index
        %c0_43 = arith.constant 0 : index
        %47 = vector.load %arg4[%c1_42, %46, %c0_43] : memref<2x8x128xf32, #tpu.memory_space<vmem>>, vector<1x1x128xf32>
        %48 = vector.shape_cast %47 : vector<1x1x128xf32> to vector<1x128xf32>
        %49 = vector.shape_cast %45 : vector<1x128xf32> to vector<1x1x128xf32>
        tpu.vector_store %arg4[%c1_42, %46, %c0_43], %49 {strides = array<i32>} : memref<2x8x128xf32, #tpu.memory_space<vmem>>, vector<1x1x128xf32>,
      } else {
      }
      scf.yield %33 : i32
    }
    %c8_i32_22 = arith.constant 8 : i32
    %c0 = arith.constant 0 : index
    %c0_23 = arith.constant 0 : index
    %16 = vector.load %arg3[%c0, %c0_23] : memref<8x128xf32, #tpu.memory_space<vmem>>, vector<8x128xf32>
    %c0_24 = arith.constant 0 : index
    %c0_25 = arith.constant 0 : index
    %c0_26 = arith.constant 0 : index
    %17 = vector.load %arg4[%c0_24, %c0_25, %c0_26] : memref<2x8x128xf32, #tpu.memory_space<vmem>>, vector<1x8x128xf32>
    %18 = vector.shape_cast %17 : vector<1x8x128xf32> to vector<8x128xf32>
    %19 = arith.addf %18, %16 : vector<8x128xf32>
    %c0_27 = arith.constant 0 : index
    %c0_28 = arith.constant 0 : index
    %c0_29 = arith.constant 0 : index
    %20 = vector.load %arg4[%c0_27, %c0_28, %c0_29] : memref<2x8x128xf32, #tpu.memory_space<vmem>>, vector<1x8x128xf32>
    %21 = vector.shape_cast %20 : vector<1x8x128xf32> to vector<8x128xf32>
    %22 = vector.shape_cast %19 : vector<8x128xf32> to vector<1x8x128xf32>
    tpu.vector_store %arg4[%c0_27, %c0_28, %c0_29], %22 {strides = array<i32>} : memref<2x8x128xf32, #tpu.memory_space<vmem>>, vector<1x8x128xf32>,
    %c1 = arith.constant 1 : index
    %c0_30 = arith.constant 0 : index
    %c0_31 = arith.constant 0 : index
    %23 = vector.load %arg4[%c1, %c0_30, %c0_31] : memref<2x8x128xf32, #tpu.memory_space<vmem>>, vector<1x8x128xf32>
    %24 = vector.shape_cast %23 : vector<1x8x128xf32> to vector<8x128xf32>
    %25 = arith.addf %24, %16 : vector<8x128xf32>
    %c1_32 = arith.constant 1 : index
    %c0_33 = arith.constant 0 : index
    %c0_34 = arith.constant 0 : index
    %26 = vector.load %arg4[%c1_32, %c0_33, %c0_34] : memref<2x8x128xf32, #tpu.memory_space<vmem>>, vector<1x8x128xf32>
    %27 = vector.shape_cast %26 : vector<1x8x128xf32> to vector<8x128xf32>
    %28 = vector.shape_cast %25 : vector<8x128xf32> to vector<1x8x128xf32>
    tpu.vector_store %arg4[%c1_32, %c0_33, %c0_34], %28 {strides = array<i32>} : memref<2x8x128xf32, #tpu.memory_space<vmem>>, vector<1x8x128xf32>,
    return
  }
  func.func @transform_1(%arg0: i32, %arg1: memref<2x8xi32, #tpu.memory_space<smem>>) -> (i32, i32) {
    %c0_i32 = arith.constant 0 : i32
    %c0_i32_0 = arith.constant 0 : i32
    %c0_i32_1 = arith.constant 0 : i32
    return %c0_i32, %c0_i32_0 : i32, i32
  }
  func.func @transform_2(%arg0: i32, %arg1: memref<2x8xi32, #tpu.memory_space<smem>>) -> (i32, i32, i32) {
    %c0_i32 = arith.constant 0 : i32
    %c0_i32_0 = arith.constant 0 : i32
    %c0_i32_1 = arith.constant 0 : i32
    return %arg0, %c0_i32, %c0_i32_0 : i32, i32, i32
  }
}

</mosaic_0001>

<bundles_post_ra>
// kernel: tpu_custom_call.1
= control target key start
LH: loop header
LB: loop body
LE: loop exit
PB: predicated region body
PF: predicated region fallthrough
CT: control target
= control target key end

     0   :  { %s692_s12 = smov [#allocation4]   ;;  %s841_s0 = inlined_call_operand.hbm [shape: s32[2,8], index: 0, kind: input, shape index: {}]   ;;  %s842_s1 = inlined_call_operand.hbm [shape: f32[64,128], index: 1, kind: input, shape index: {}]   ;;  %s843_s2 = inlined_call_operand.hbm [shape: f32[8,128], index: 2, kind: input, shape index: {}]   ;;  %s844_s3 = inlined_call_operand.hbm [shape: f32[2,8,128], index: 3, kind: output, shape index: {}]  }
   0x1   :  { %9 = dma.hbm_to_smem %s841_s0, 32, %s692_s12, [#allocation3] }
   0x2   :  { %646 = dma.done.wait [#allocation3], 32 }
   0x3   :  { %647 = vsyncadd [#allocation3], 4294967264 }
   0x4   :  { %11 = sfence }
   0x5   :  { %12 = vsyncpa [#allocation6], 0 }
   0x6   :  { %13 = vsyncpa [#allocation7], 0  ;;  %s693_s15 = smov [#allocation5]  }
   0x7   :  { %s20_s16 = sshll.u32 %s693_s15, 4  ;;  %s21_s16 = int_to_ptr.vmem [resolvable:$true] %s20_s16 }
   0x8   :  { %s530_s17 = scalar_lea.vmem %s21_s16, 128  ;;  %p535_p1 = scmp.lt.s32.totalorder %s21_s16, %s21_s16 }
   0x9   :  { %p531_p0 = scmp.ne.s32.totalorder %s21_s16, %s530_s17  ;;  %p536_p2 = scmp.lt.s32.totalorder %s530_s17, %s530_s17 }
   0xb   :  { %p537_p3 = por %p536_p2, %p535_p1 }
   0xd   :  { %p538_p4 = pnand %p537_p3, %p531_p0 }
   0xf   :  { %541 = shalt.err (!%p538_p4)
}
  0x10   :  { %23 = dma.hbm_to_vmem [thread:$0]  %s843_s2, 128, %s21_s16, [#allocation6]  }
  0x11   :  { %648 = dma.done.wait [#allocation6], 128  }
  0x12   :  { %649 = vsyncadd [#allocation6], 4294967168  ;;  %s723_s0 = smov 4294967295   ;;  %s725_s20 = smov 0  }
  0x13 LB: > { %s35_s21 = sshra.s32 %s666_s20, 7  ;;  %s40_s22 = sand.u32 127, %s666_s20  ;;  %s666_s20 = sphi %s725_s20, %s33_s20   ;;  %s662_s0 = sphi %s723_s0, %s846_s0  }
  0x14   : > { %s374_s2 = sshll.u32 %s35_s21, 7  ;;  %p47_p7 = scmp.eq.s32.totalorder %s666_s20, 0 }
  0x15   : > { %s41_s23 = sadd.s32 %s374_s2, %s40_s22  ;;  %s55_s25 = scalar_lea.vmem [#allocation8], %s666_s20 }
  0x16   : > { %s42_s24 = sld [smem:[#allocation4 + %s41_s23]]  ;;  %s64_s26 = sshll.u32 %s55_s25, 4  ;;  %s65_s26 = int_to_ptr.vmem [resolvable:$true] %s64_s26 }
  0x17   : > { %s56_s5 = scalar_lea.sflag [#allocation2], %s666_s20  ;;  %s546_s9 = scalar_lea.hbm %s842_s1, 1024 }
  0x1c   : > { %p43_p5 = scmp.gt.s32.totalorder %s42_s24, 0  ;;  %p375_p6 = scmp.lt.s32.totalorder %s42_s24, 63 }
  0x1e   : > { %s852_s24 = smov (!%p43_p5, %s42_s24), 0 }
  0x1f   : > { %s854_s24 = smov (!%p375_p6, %s852_s24), 63 }
  0x20   : > { %p48_p8 = scmp.ne.s32.totalorder %s854_s24, %s662_s0  ;;  %s380_s27 = sshll.u32 %s854_s24, 4 }
  0x21   : > { %s54_s30 = scalar_lea.hbm %s842_s1, %s380_s27 }
  0x22   : > { %p742_p9 = por %p48_p8, %p47_p7  ;;  %s542_s6 = scalar_lea.hbm %s54_s30, 16 }
  0x23   : > { %p543_p10 = scmp.ne.s32.totalorder %s54_s30, %s542_s6  ;;  %p547_p13 = scmp.lt.s32.totalorder %s54_s30, %s842_s1 }
  0x24   : > { %p548_p0 = scmp.lt.s32.totalorder %s546_s9, %s542_s6 }
  0x25   : > { %p544_p11 = pnand %p543_p10, %p742_p9 }
  0x26   : > { %p549_p1 = por %p548_p0, %p547_p13 }
  0x27   : > { %p545_p12 = pneg %p544_p11 }
  0x29   : > { %p550_p2 = pnand %p549_p1, %p545_p12 }
  0x2b   : > { %553 = shalt.err (!%p550_p2)  }
  0x2c   : > { %s554_s14 = scalar_lea.vmem %s65_s26, 16  ;;  %s694_s15 = smov [#allocation8]  }
  0x2d   : > { %p555_p3 = scmp.ne.s32.totalorder %s65_s26, %s554_s14  ;;  %s558_s16 = sshll.u32 %s694_s15, 4  ;;  %s761_s16 = int_to_ptr.vmem [resolvable:$false] %s558_s16 }
  0x2e   : > { %s764_s17 = scalar_lea.vmem %s761_s16, 256  ;;  %p561_p6 = scmp.lt.s32.totalorder %s65_s26, %s761_s16 }
  0x2f   : > { %p556_p4 = pnand %p555_p3, %p742_p9  ;;  %p562_p7 = scmp.lt.s32.totalorder %s764_s17, %s554_s14 }
  0x31   : > { %p557_p5 = pneg %p556_p4  ;;  %p563_p8 = por %p562_p7, %p561_p6 }
  0x33   : > { %p564_p10 = pnand %p563_p8, %p557_p5 }
  0x35   : > { %567 = shalt.err (!%p564_p10)  }
  0x36   : > { %441 = dma.hbm_to_vmem [thread:$0]  (%p742_p9), %s54_s30, 16, %s65_s26, %s56_s5 }
  0x37   : > { %s33_s20 = sadd.s32 1, %s666_s20   ;;  %s846_s0 = smov %s854_s24 }
  0x38   : > { %p30_p11 = scmp.ge.s32.totalorder %s33_s20, 8  }
  0x39   :  { %s776_s18 = smov (%p30_p11), 4294967295   ;;  %s778_s19 = smov (%p30_p11), 0  }
  0x3a   :  { %32 = sbr.rel (!%p30_p11) target bundleno = 19 (0x13), region = 116 }
  0x3f LB: > { %s76_s21 = sshra.s32 %s674_s19, 7  ;;  %s81_s22 = sand.u32 127, %s674_s19  ;;  %s674_s19 = sphi %s778_s19, %s74_s19   ;;  %s670_s18 = sphi %s776_s18, %s848_s18  }
  0x40   : > { %s424_s20 = sshll.u32 %s76_s21, 7  ;;  %s329_s24 = scalar_lea.vmem [#allocation8], %s674_s19 }
  0x41   : > { %s425_s2 = sadd.s32 128, %s424_s20  ;;  %s330_s25 = scalar_lea.vmem %s329_s24, 8 [#allocation8] }
  0x42   : > { %s82_s0 = sadd.s32 %s425_s2, %s81_s22  ;;  %p88_p13 = scmp.eq.s32.totalorder %s674_s19, 0 }
  0x43   : > { %s83_s23 = sld [smem:[#allocation4 + %s82_s0]]  ;;  %s106_s26 = sshll.u32 %s330_s25, 4  ;;  %s107_s26 = int_to_ptr.vmem [resolvable:$true] %s106_s26 }
  0x44   : > { %s331_s27 = scalar_lea.sflag [#allocation2], %s674_s19 }
  0x45   : > { %s332_s28 = scalar_lea.sflag %s331_s27, 8 [#allocation2] }
  0x49   : > { %p84_p9 = scmp.gt.s32.totalorder %s83_s23, 0  ;;  %p382_p12 = scmp.lt.s32.totalorder %s83_s23, 63 }
  0x4b   : > { %s856_s23 = smov (!%p84_p9, %s83_s23), 0 }
  0x4c   : > { %s858_s23 = smov (!%p382_p12, %s856_s23), 63 }
  0x4d   : > { %p89_p0 = scmp.ne.s32.totalorder %s858_s23, %s670_s18  ;;  %s387_s29 = sshll.u32 %s858_s23, 4 }
  0x4e   : > { %s95_s5 = scalar_lea.hbm %s842_s1, %s387_s29 }
  0x4f   : > { %p792_p1 = por %p89_p0, %p88_p13  ;;  %s568_s7 = scalar_lea.hbm %s95_s5, 16 }
  0x50   : > { %p569_p2 = scmp.ne.s32.totalorder %s95_s5, %s568_s7  ;;  %p573_p5 = scmp.lt.s32.totalorder %s95_s5, %s842_s1 }
  0x51   : > { %p574_p6 = scmp.lt.s32.totalorder %s546_s9, %s568_s7 }
  0x52   : > { %p570_p3 = pnand %p569_p2, %p792_p1 }
  0x53   : > { %p575_p7 = por %p574_p6, %p573_p5 }
  0x54   : > { %p571_p4 = pneg %p570_p3 }
  0x56   : > { %p576_p8 = pnand %p575_p7, %p571_p4 }
  0x58   : > { %579 = shalt.err (!%p576_p8)  }
  0x59   : > { %s580_s13 = scalar_lea.vmem %s107_s26, 16  ;;  %p587_p12 = scmp.lt.s32.totalorder %s107_s26, %s761_s16 }
  0x5a   : > { %p581_p10 = scmp.ne.s32.totalorder %s107_s26, %s580_s13  ;;  %p588_p13 = scmp.lt.s32.totalorder %s764_s17, %s580_s13 }
  0x5c   : > { %p582_p11 = pnand %p581_p10, %p792_p1  ;;  %p589_p0 = por %p588_p13, %p587_p12 }
  0x5e   : > { %p583_p9 = pneg %p582_p11 }
  0x60   : > { %p590_p2 = pnand %p589_p0, %p583_p9 }
  0x62   : > { %593 = shalt.err (!%p590_p2)  }
  0x63   : > { %442 = dma.hbm_to_vmem [thread:$0]  (%p792_p1), %s95_s5, 16, %s107_s26, %s332_s28 }
  0x64   : > { %s74_s19 = sadd.s32 1, %s674_s19   ;;  %s848_s18 = smov %s858_s23 }
  0x65   : > { %p71_p3 = scmp.ge.s32.totalorder %s74_s19, 8  }
  0x66   :  { %s816_s14 = smov (%p71_p3), 4294967295   ;;  %s680_s15 = smov (%p71_p3), 0  }
  0x67   :  { %73 = sbr.rel (!%p71_p3) target bundleno = 63 (0x3f), region = 127 }
  0x6c LB: > { %s117_s21 = sshra.s32 %s682_s15, 7  ;;  %s122_s22 = sand.u32 127, %s682_s15  ;;  %s682_s15 = sphi %s680_s15, %s115_s15   ;;  %s678_s14 = sphi %s816_s14, %s849_s14  }
  0x6d   : > { %s388_s20 = sshll.u32 %s117_s21, 7  ;;  %p129_p5 = scmp.eq.s32.totalorder %s682_s15, 0 }
  0x6e   : > { %s123_s2 = sadd.s32 %s388_s20, %s122_s22  ;;  %s135_s1 = scalar_lea.sflag [#allocation2], %s682_s15 }
  0x6f   : > { %s124_s0 = sld [smem:[#allocation4 + %s123_s2]] }
  0x75   : > { %p125_p1 = scmp.gt.s32.totalorder %s124_s0, 0  ;;  %p389_p4 = scmp.lt.s32.totalorder %s124_s0, 63 }
  0x77   : > { %s860_s0 = smov (!%p125_p1, %s124_s0), 0 }
  0x78   : > { %s862_s0 = smov (!%p389_p4, %s860_s0), 63 }
  0x79   : > { %p130_p6 = scmp.ne.s32.totalorder %s862_s0, %s678_s14 }
  0x7b   : > { %p131_p7 = por %p130_p6, %p129_p5 }
  0x7d   : > { %651 = dma.done.wait (%p131_p7), %s135_s1, 16 }
  0x7e   : > { %653 = vsyncadd (%p131_p7), %s135_s1, 4294967280  ;;  %141 = sbr.rel (%p131_p7) target bundleno = 133 (0x85), region = 54  ;;  %s430_s9 = scalar_lea.vmem (!%p131_p7), [#allocation8], %s682_s15 }
  0x83   : > { %v432_v0 = vld [vmem:[%s430_s9 - $0x1] sm:$0x1] }
  0x84   : > { %146 = vst [vmem:[%s430_s9] sm:$0x1] %v432_v0 }
  0x85 PF: > { %s115_s15 = sadd.s32 1, %s682_s15   ;;  %s849_s14 = smov %s862_s0 }
  0x86   : > { %p112_p8 = scmp.ge.s32.totalorder %s115_s15, 8  }
  0x87   :  { %s821_s18 = smov (%p112_p8), 4294967295   ;;  %s823_s19 = smov (%p112_p8), 0  }
  0x88   :  { %114 = sbr.rel (!%p112_p8) target bundleno = 108 (0x6c), region = 138 }
  0x8d LB: > { %s154_s23 = sshra.s32 %s690_s19, 7  ;;  %s159_s24 = sand.u32 127, %s690_s19  ;;  %s690_s19 = sphi %s823_s19, %s152_s19   ;;  %s686_s18 = sphi %s821_s18, %s850_s18  }
  0x8e   : > { %s433_s25 = sshll.u32 %s154_s23, 7  ;;  %s336_s28 = scalar_lea.sflag [#allocation2], %s690_s19 }
  0x8f   : > { %s434_s26 = sadd.s32 128, %s433_s25  ;;  %s337_s29 = scalar_lea.sflag %s336_s28, 8 [#allocation2] }
  0x90   : > { %s160_s27 = sadd.s32 %s434_s26, %s159_s24  ;;  %p166_p9 = scmp.eq.s32.totalorder %s690_s19, 0 }
  0x91   : > { %s161_s30 = sld [smem:[#allocation4 + %s160_s27]] }
  0x97   : > { %p162_p10 = scmp.gt.s32.totalorder %s161_s30, 0  ;;  %p397_p11 = scmp.lt.s32.totalorder %s161_s30, 63 }
  0x99   : > { %s864_s30 = smov (!%p162_p10, %s161_s30), 0 }
  0x9a   : > { %s866_s30 = smov (!%p397_p11, %s864_s30), 63 }
  0x9b   : > { %p167_p12 = scmp.ne.s32.totalorder %s866_s30, %s686_s18 }
  0x9d   : > { %p168_p13 = por %p167_p12, %p166_p9 }
  0x9f   : > { %655 = dma.done.wait (%p168_p13), %s337_s29, 16 }
  0xa0   : > { %657 = vsyncadd (%p168_p13), %s337_s29, 4294967280  ;;  %179 = sbr.rel (%p168_p13) target bundleno = 167 (0xa7), region = 69  ;;  %s437_s4 = scalar_lea.vmem (!%p168_p13), [#allocation8], %s690_s19 }
  0xa5   : > { %v440_v1 = vld [vmem:[%s437_s4 + $0x7] sm:$0x1] }
  0xa6   : > { %405 = vst [vmem:[%s437_s4 + $0x8] sm:$0x1] %v440_v1 }
  0xa7 PF: > { %s152_s19 = sadd.s32 1, %s690_s19   ;;  %s850_s18 = smov %s866_s30 }
  0xa8   : > { %p149_p0 = scmp.ge.s32.totalorder %s152_s19, 8  }
  0xa9   :  { %v187_v2 = vld [vmem:[#allocation5] sm:$0xff] (%p149_p0)  ;;  %p595_p2 = scmp.ne.s32.totalorder (%p149_p0), %s761_s16, %s764_s17  ;;  %p599_p3 = scmp.lt.s32.totalorder (%p149_p0), %s761_s16, %s761_s16 }
  0xaa   :  { %151 = sbr.rel (!%p149_p0) target bundleno = 141 (0x8d), region = 149  ;;  %p600_p1 = scmp.lt.s32.totalorder (%p149_p0), %s764_s17, %s764_s17 }
  0xac   :  { %p601_p4 = por (%p149_p0), %p600_p1, %p599_p3 }
  0xad   :  { %v188_v3 = vld [vmem:[#allocation8] sm:$0xff] (%p149_p0)  ;;  %v192_v4 = vld [vmem:[#allocation8 + $0x8] sm:$0xff] (%p149_p0) }
  0xae   :  { %v189_v5 = vadd.f32 (%p149_p0), %v188_v3, %v187_v2  ;;  %v193_v6 = vadd.f32 (%p149_p0), %v192_v4, %v187_v2  ;;  %p602_p5 = pnand (%p149_p0), %p601_p4, %p595_p2 }
  0xb0   :  { %190 = vst [vmem:[#allocation8] sm:$0xff] %v189_v5  ;;  %194 = vst [vmem:[#allocation8 + $0x8] sm:$0xff] %v193_v6 }
  0xb1   :  { %605 = shalt.err (!%p602_p5)
}
  0xb2   :  { %s695_s5 = smov 128   ;;  %s696_s6 = smov 8  }
  0xb3   :  { %206 = dma.vmem_to_hbm [thread:$0]  %s761_s16, 256, %s844_s3, [#allocation7], %s695_s5, %s695_s5, %s696_s6  }
  0xb4   :  { %658 = dma.done.wait [#allocation7], 256  }
  0xb5   :  { %659 = vsyncadd [#allocation7], 4294967040 }
  0xb6   :  { %210 = vsyncpa [#allocation6], 1 }
  0xb7   :  { %211 = vsyncpa [#allocation7], 1 }
  0xb8   :  { %212 = vsyncmov [#allocation2] }
  0xbb   :  { %s213_s10 = vpop.sfrf %212 }
  0xbc   :  { %p406_p6 = scmp.ne.s32.totalorder %s213_s10, 0 }
  0xbe   :  { %217 = shalt.err (%p406_p6)  }
  0xbf   :  { %219 = vsyncmov [#allocation2 + $0x1] }
  0xc2   :  { %s220_s17 = vpop.sfrf %219 }
  0xc3   :  { %p407_p7 = scmp.ne.s32.totalorder %s220_s17, 0 }
  0xc5   :  { %224 = shalt.err (%p407_p7)  }
  0xc6   :  { %226 = vsyncmov [#allocation2 + $0x2] }
  0xc9   :  { %s227_s11 = vpop.sfrf %226 }
  0xca   :  { %p408_p8 = scmp.ne.s32.totalorder %s227_s11, 0 }
  0xcc   :  { %231 = shalt.err (%p408_p8)  }
  0xcd   :  { %233 = vsyncmov [#allocation2 + $0x3] }
  0xd0   :  { %s234_s12 = vpop.sfrf %233 }
  0xd1   :  { %p409_p10 = scmp.ne.s32.totalorder %s234_s12, 0 }
  0xd3   :  { %238 = shalt.err (%p409_p10)  }
  0xd4   :  { %240 = vsyncmov [#allocation2 + $0x4] }
  0xd7   :  { %s241_s3 = vpop.sfrf %240 }
  0xd8   :  { %p410_p11 = scmp.ne.s32.totalorder %s241_s3, 0 }
  0xda   :  { %245 = shalt.err (%p410_p11)  }
  0xdb   :  { %247 = vsyncmov [#allocation2 + $0x5] }
  0xde   :  { %s248_s16 = vpop.sfrf %247 }
  0xdf   :  { %p411_p9 = scmp.ne.s32.totalorder %s248_s16, 0 }
  0xe1   :  { %252 = shalt.err (%p411_p9)  }
  0xe2   :  { %254 = vsyncmov [#allocation2 + $0x6] }
  0xe5   :  { %s255_s13 = vpop.sfrf %254 }
  0xe6   :  { %p412_p12 = scmp.ne.s32.totalorder %s255_s13, 0 }
  0xe8   :  { %259 = shalt.err (%p412_p12)  }
  0xe9   :  { %261 = vsyncmov [#allocation2 + $0x7] }
  0xec   :  { %s262_s14 = vpop.sfrf %261 }
  0xed   :  { %p413_p13 = scmp.ne.s32.totalorder %s262_s14, 0 }
  0xef   :  { %266 = shalt.err (%p413_p13)  }
  0xf0   :  { %268 = vsyncmov [#allocation2 + $0x8] }
  0xf3   :  { %s269_s15 = vpop.sfrf %268 }
  0xf4   :  { %p414_p0 = scmp.ne.s32.totalorder %s269_s15, 0 }
  0xf6   :  { %273 = shalt.err (%p414_p0)  }
  0xf7   :  { %275 = vsyncmov [#allocation2 + $0x9] }
  0xfa   :  { %s276_s21 = vpop.sfrf %275 }
  0xfb   :  { %p415_p2 = scmp.ne.s32.totalorder %s276_s21, 0 }
  0xfd   :  { %280 = shalt.err (%p415_p2)  }
  0xfe   :  { %282 = vsyncmov [#allocation2 + $0xa] }
 0x101   :  { %s283_s22 = vpop.sfrf %282 }
 0x102   :  { %p416_p3 = scmp.ne.s32.totalorder %s283_s22, 0 }
 0x104   :  { %287 = shalt.err (%p416_p3)  }
 0x105   :  { %289 = vsyncmov [#allocation2 + $0xb] }
 0x108   :  { %s290_s20 = vpop.sfrf %289 }
 0x109   :  { %p417_p1 = scmp.ne.s32.totalorder %s290_s20, 0 }
 0x10b   :  { %294 = shalt.err (%p417_p1)  }
 0x10c   :  { %296 = vsyncmov [#allocation2 + $0xc] }
 0x10f   :  { %s297_s2 = vpop.sfrf %296 }
 0x110   :  { %p418_p4 = scmp.ne.s32.totalorder %s297_s2, 0 }
 0x112   :  { %301 = shalt.err (%p418_p4)  }
 0x113   :  { %303 = vsyncmov [#allocation2 + $0xd] }
 0x116   :  { %s304_s0 = vpop.sfrf %303 }
 0x117   :  { %p419_p5 = scmp.ne.s32.totalorder %s304_s0, 0 }
 0x119   :  { %308 = shalt.err (%p419_p5)  }
 0x11a   :  { %310 = vsyncmov [#allocation2 + $0xe] }
 0x11d   :  { %s311_s1 = vpop.sfrf %310 }
 0x11e   :  { %p420_p6 = scmp.ne.s32.totalorder %s311_s1, 0 }
 0x120   :  { %315 = shalt.err (%p420_p6)  }
 0x121   :  { %317 = vsyncmov [#allocation2 + $0xf] }
 0x124   :  { %s318_s9 = vpop.sfrf %317 }
 0x125   :  { %p421_p7 = scmp.ne.s32.totalorder %s318_s9, 0 }
 0x127   :  { %322 = shalt.err (%p421_p7)  }

</bundles_post_ra>
